<compile_context>
chip_gen: v7x
topology: tpu7x:2x2x1
jax: 0.10.0
libtpu: 0.0.40
codegen_flags: <defaults>
</compile_context>

<pallas_src>
import functools

import jax
import jax.numpy as jnp
from jax.experimental import pallas as pl
from jax.experimental.pallas import tpu as pltpu


def layer_norm_kernel(x_ref, gamma_ref, beta_ref, o_ref, *, eps, n_seg,
                      keep_input_dtype):
    """Normalize each length-D segment of every packed row.

    x tile: (tile_rows, Dp) with Dp = n_seg * D.  n_seg > 1 only when small
    rows (D < 128) were folded along lanes in the wrapper so stores stay
    lane-dense.  Reductions always accumulate in f32 (two-pass / biased var,
    exactly like F.layer_norm); the elementwise center/scale/shift stays in the
    input dtype on bf16-capable chips to halve VPU work and vreg traffic.
    """
    x = x_ref[...]                                   # (t, Dp), input dtype
    t, dp = x.shape
    xs = x.reshape(t, n_seg, dp // n_seg) if n_seg > 1 else x

    xf = xs.astype(jnp.float32)
    mean = jnp.mean(xf, axis=-1, keepdims=True)      # f32 XLU reduce
    xc = xf - mean
    var = jnp.mean(xc * xc, axis=-1, keepdims=True)  # biased variance
    inv = jax.lax.rsqrt(var + eps)                   # EUP slot (nearly free)

    if keep_input_dtype and x.dtype != jnp.float32:
        # bf16-native elementwise path (v6e/v7x); reductions above stayed f32.
        yn = (xs - mean.astype(x.dtype)) * inv.astype(x.dtype)
    else:
        yn = xc * inv

    y = yn.reshape(t, dp) if n_seg > 1 else yn
    # gamma/beta were cast + lane-tiled once in the wrapper; index_map always
    # returns block (0, 0) so they are resident (no re-DMA, no per-step cast).
    o_ref[...] = (y * gamma_ref[...] + beta_ref[...]).astype(o_ref.dtype)


def _vmem_capacity_bytes():
    """Generation-aware VMEM capacity; conservative fallback if query fails."""
    try:
        return int(pltpu.get_tpu_info().vmem_capacity_bytes)
    except Exception:
        return 64 * 1024 * 1024  # v7x per-TensorCore VMEM (smallest current gen)


def _bf16_elementwise_supported():
    """v5e has no bf16 VALU/EUP -> keep elementwise math in f32 there."""
    try:
        kind = jax.devices()[0].device_kind.lower()
        return "v5" not in kind
    except Exception:
        return True


def _pick_tile_rows(R, D, dtype, vmem_budget_bytes,
                    target_block_bytes=4 * 1024 * 1024):
    """Largest row tile that fits the VMEM budget.

    - multiple of the dtype's sublane packing (8 f32 / 16 bf16 / 32 int8)
    - byte-based ceiling (multi-MiB input blocks) instead of a fixed row count
    - prefers an exact divisor of R (no masked trailing block) unless that
      would shrink the tile below half the budgeted size.
    """
    itemsize = jnp.dtype(dtype).itemsize
    sublane = max(8, 32 // itemsize)
    if R <= sublane:
        return R  # block spans the full row dim ("equals full dim" rule)

    # Per-row VMEM: double-buffered input + output tiles plus ~3 live f32
    # temporaries (the kernel keeps at most xf / xc / xc*inv alive at once).
    per_row = D * (2 * itemsize + 2 * itemsize + 3 * 4)
    cap = max(sublane, vmem_budget_bytes // per_row)

    # Aim for multi-MiB input blocks so the ~0.35 us per-grid-step overhead is
    # amortized (mem-bound efficiency plateaus around 2-4 MiB blocks).
    max_tile = max(sublane, target_block_bytes // (D * itemsize))

    tile = min(int(cap), int(max_tile), R)
    tile = max(sublane, (tile // sublane) * sublane)

    t = tile
    floor = max(sublane, tile // 2)
    while t >= floor:
        if R % t == 0:
            return t
        t -= sublane
    # No nice divisor: use the big tile; the trailing block is masked, which is
    # safe because rows are independent and only the row axis is blocked.
    return tile


def layer_norm(x, gamma, beta, eps=1e-5, *, tile_rows=None, vmem_limit_bytes=None):
    orig_shape = x.shape
    D = orig_shape[-1]
    x2 = x.reshape(-1, D)  # metadata-only reshape (contiguous)
    R = x2.shape[0]

    # Lane packing for small D: fold k = 128 // D consecutive rows into one
    # 128-lane packed row so output stores are unmasked, lane-dense vst
    # instead of masked vst.msk (up to ~4x wall-clock for tiny D).
    n_seg = 1
    if D < 128 and 128 % D == 0 and R % (128 // D) == 0:
        n_seg = 128 // D
    # TODO(synk): D < 128 with 128 % D != 0 (or ragged R) falls back to the
    # lane-sparse path; production shapes should keep D % 128 == 0.
    Dp = D * n_seg
    Rp = R // n_seg
    xp = x2.reshape(Rp, Dp)  # still metadata-only (row-major contiguous)

    vmem_cap = _vmem_capacity_bytes()
    if vmem_limit_bytes is None:
        # Raise the scoped VMEM limit with headroom (v7x 64 MiB, v5e/v6e 128 MiB).
        vmem_limit_bytes = int(min(vmem_cap * 3 // 4, 100 * 1024 * 1024))
    if tile_rows is None:
        # per_row already models double-buffering + temps; only shave 10% slack
        # (the old //2 double-discount halved the block size for nothing).
        tile_rows = _pick_tile_rows(Rp, Dp, x.dtype, int(vmem_limit_bytes * 0.9))

    # bf16-native elementwise on bf16-capable chips; reductions stay f32.
    keep_input_dtype = (x.dtype == jnp.bfloat16) and _bf16_elementwise_supported()
    param_dtype = x.dtype if keep_input_dtype else jnp.float32

    # Cast + lane-tile scale/shift once on the host side; resident across grid.
    gamma_p = jnp.tile(gamma.reshape(1, D).astype(param_dtype), (1, n_seg))
    beta_p = jnp.tile(beta.reshape(1, D).astype(param_dtype), (1, n_seg))

    grid = (pl.cdiv(Rp, tile_rows),)

    out = pl.pallas_call(
        functools.partial(layer_norm_kernel, eps=eps, n_seg=n_seg,
                          keep_input_dtype=keep_input_dtype),
        out_shape=jax.ShapeDtypeStruct((Rp, Dp), x.dtype),
        grid_spec=pltpu.PrefetchScalarGridSpec(
            num_scalar_prefetch=0,
            grid=grid,
            in_specs=[
                pl.BlockSpec((tile_rows, Dp), lambda i: (i, 0)),
                pl.BlockSpec((1, Dp), lambda i: (0, 0)),  # gamma: resident
                pl.BlockSpec((1, Dp), lambda i: (0, 0)),  # beta: resident
            ],
            out_specs=pl.BlockSpec((tile_rows, Dp), lambda i: (i, 0)),
        ),
        compiler_params=pltpu.CompilerParams(
            # TODO(synk): on v7x confirm "parallel" shards the row axis across
            # both TensorCores; if not, switch to pltpu.CORE_PARALLEL here.
            dimension_semantics=("parallel",),
            vmem_limit_bytes=vmem_limit_bytes,
        ),
    )(xp, gamma_p, beta_p)

    return out.reshape(orig_shape)


def _ref_layer_norm(x, gamma, beta, eps):
    mean = jnp.mean(x, axis=-1, keepdims=True)
    var = jnp.mean((x - mean) ** 2, axis=-1, keepdims=True)
    return (x - mean) / jnp.sqrt(var + eps) * gamma + beta


if __name__ == "__main__":
    key = jax.random.PRNGKey(0)
    batch, seq, embed_dim = 2, 8, 32

    x = jax.random.normal(key, (batch, seq, embed_dim), dtype=jnp.float32)
    # Deterministic parameter init matching the PyTorch module's __init__.
    gamma = jnp.ones((embed_dim,), dtype=jnp.float32)
    beta = jnp.zeros((embed_dim,), dtype=jnp.float32)

    y = layer_norm(x, gamma, beta, eps=1e-5)
    jax.block_until_ready(y)
    ref = _ref_layer_norm(x, gamma, beta, 1e-5)
    assert jnp.allclose(y, ref, atol=1e-5, rtol=1e-5), "mismatch vs reference (D=32)"

    # Second check: non-trivial gamma/beta and a lane-dense D (non-packed path).
    k1, k2, k3 = jax.random.split(jax.random.PRNGKey(0), 3)
    D2 = 256
    x2 = jax.random.normal(k1, (batch, seq, D2), dtype=jnp.float32)
    g2 = jax.random.normal(k2, (D2,), dtype=jnp.float32)
    b2 = jax.random.normal(k3, (D2,), dtype=jnp.float32)
    y2 = layer_norm(x2, g2, b2, eps=1e-5)
    jax.block_until_ready(y2)
    ref2 = _ref_layer_norm(x2, g2, b2, 1e-5)
    assert jnp.allclose(y2, ref2, atol=1e-4, rtol=1e-4), "mismatch vs reference (D=256)"

    print("KERNEL_OK")
</pallas_src>

<mosaic_0001>
module attributes {stable_mosaic.version = 11 : i64} {
  func.func @layer_norm_kernel(%arg0: i32, %arg1: memref<4x128xf32, #tpu.memory_space<vmem>>, %arg2: memref<1x128xf32, #tpu.memory_space<vmem>>, %arg3: memref<1x128xf32, #tpu.memory_space<vmem>>, %arg4: memref<4x128xf32, #tpu.memory_space<vmem>>) attributes {dimension_semantics = [#tpu.dimension_semantics<parallel>], iteration_bounds = array<i64: 1>, scalar_prefetch = 0 : i64, scratch_operands = 0 : i64, tpu.core_type = #tpu.core_type<tc>, window_params = [{transform_indices = @transform_0, window_bounds = array<i64: 4, 128>}, {pipeline_mode = #tpu.pipeline_mode<synchronous>, transform_indices = @transform_1, window_bounds = array<i64: 1, 128>}, {pipeline_mode = #tpu.pipeline_mode<synchronous>, transform_indices = @transform_2, window_bounds = array<i64: 1, 128>}, {transform_indices = @transform_3, window_bounds = array<i64: 4, 128>}]} {
    %c0 = arith.constant 0 : index
    %c0_0 = arith.constant 0 : index
    %0 = vector.load %arg1[%c0, %c0_0] : memref<4x128xf32, #tpu.memory_space<vmem>>, vector<4x128xf32>
    %1 = vector.shape_cast %0 : vector<4x128xf32> to vector<4x4x32xf32>
    %cst = arith.constant dense<0.000000e+00> : vector<4x4xf32>
    %2 = vector.multi_reduction <add>, %1, %cst [2] : vector<4x4x32xf32> to vector<4x4xf32>
    %3 = vector.shape_cast %2 : vector<4x4xf32> to vector<4x4x1xf32>
    %cst_1 = arith.constant 3.200000e+01 : f32
    %4 = vector.broadcast %cst_1 : f32 to vector<4x4x1xf32>
    %5 = arith.divf %3, %4 : vector<4x4x1xf32>
    %6 = vector.broadcast %5 : vector<4x4x1xf32> to vector<4x4x32xf32>
    %7 = arith.subf %1, %6 : vector<4x4x32xf32>
    %8 = arith.mulf %7, %7 : vector<4x4x32xf32>
    %cst_2 = arith.constant dense<0.000000e+00> : vector<4x4xf32>
    %9 = vector.multi_reduction <add>, %8, %cst_2 [2] : vector<4x4x32xf32> to vector<4x4xf32>
    %10 = vector.shape_cast %9 : vector<4x4xf32> to vector<4x4x1xf32>
    %cst_3 = arith.constant 3.200000e+01 : f32
    %11 = vector.broadcast %cst_3 : f32 to vector<4x4x1xf32>
    %12 = arith.divf %10, %11 : vector<4x4x1xf32>
    %cst_4 = arith.constant 9.99999974E-6 : f32
    %13 = vector.broadcast %cst_4 : f32 to vector<4x4x1xf32>
    %14 = arith.addf %12, %13 : vector<4x4x1xf32>
    %15 = math.rsqrt %14 : vector<4x4x1xf32>
    %16 = vector.broadcast %15 : vector<4x4x1xf32> to vector<4x4x32xf32>
    %17 = arith.mulf %7, %16 : vector<4x4x32xf32>
    %18 = vector.shape_cast %17 : vector<4x4x32xf32> to vector<4x128xf32>
    %c0_5 = arith.constant 0 : index
    %c0_6 = arith.constant 0 : index
    %19 = vector.load %arg2[%c0_5, %c0_6] : memref<1x128xf32, #tpu.memory_space<vmem>>, vector<1x128xf32>
    %20 = vector.broadcast %19 : vector<1x128xf32> to vector<4x128xf32>
    %21 = arith.mulf %18, %20 : vector<4x128xf32>
    %c0_7 = arith.constant 0 : index
    %c0_8 = arith.constant 0 : index
    %22 = vector.load %arg3[%c0_7, %c0_8] : memref<1x128xf32, #tpu.memory_space<vmem>>, vector<1x128xf32>
    %23 = vector.broadcast %22 : vector<1x128xf32> to vector<4x128xf32>
    %24 = arith.addf %21, %23 : vector<4x128xf32>
    %c0_9 = arith.constant 0 : index
    %c0_10 = arith.constant 0 : index
    %25 = vector.load %arg4[%c0_9, %c0_10] : memref<4x128xf32, #tpu.memory_space<vmem>>, vector<4x128xf32>
    tpu.vector_store %arg4[%c0_9, %c0_10], %24 {strides = array<i32>} : memref<4x128xf32, #tpu.memory_space<vmem>>, vector<4x128xf32>,
    return
  }
  func.func @transform_0(%arg0: i32) -> (i32, i32) {
    %c0_i32 = arith.constant 0 : i32
    %c0_i32_0 = arith.constant 0 : i32
    return %arg0, %c0_i32 : i32, i32
  }
  func.func @transform_1(%arg0: i32) -> (i32, i32) {
    %c0_i32 = arith.constant 0 : i32
    %c0_i32_0 = arith.constant 0 : i32
    %c0_i32_1 = arith.constant 0 : i32
    return %c0_i32, %c0_i32_0 : i32, i32
  }
  func.func @transform_2(%arg0: i32) -> (i32, i32) {
    %c0_i32 = arith.constant 0 : i32
    %c0_i32_0 = arith.constant 0 : i32
    %c0_i32_1 = arith.constant 0 : i32
    return %c0_i32, %c0_i32_0 : i32, i32
  }
  func.func @transform_3(%arg0: i32) -> (i32, i32) {
    %c0_i32 = arith.constant 0 : i32
    %c0_i32_0 = arith.constant 0 : i32
    return %arg0, %c0_i32 : i32, i32
  }
}

</mosaic_0001>

<bundles_post_ra>
// kernel: tpu_custom_call.1
= control target key start
LH: loop header
LB: loop body
LE: loop exit
PB: predicated region body
PF: predicated region fallthrough
CT: control target
= control target key end

     0   :  { %8 = vsyncpa [#allocation3], 0  ;;  %s364_s0 = inlined_call_operand.hbm [shape: f32[4,128], index: 0, kind: input, shape index: {}]   ;;  %s365_s1 = inlined_call_operand.vmem [shape: f32[1,128], index: 1, kind: input, shape index: {}]   ;;  %s366_s2 = inlined_call_operand.vmem [shape: f32[1,128], index: 2, kind: input, shape index: {}]   ;;  %s367_s3 = inlined_call_operand.hbm [shape: f32[4,128], index: 3, kind: output, shape index: {}]  }
   0x1   :  { %9 = vsyncpa [#allocation4], 0  ;;  %s276_s12 = smov [#allocation2]   ;;  %s228_s16 = scalar_lea.hbm %s364_s0, 64 }
   0x2   :  { %s16_s13 = sshll.u32 %s276_s12, 4  ;;  %p229_p0 = scmp.ne.s32.totalorder %s364_s0, %s228_s16  ;;  %s17_s13 = int_to_ptr.vmem [resolvable:$true] %s16_s13 }
   0x3   :  { %p232_p1 = scmp.lt.u32.totalorder %s228_s16, %s364_s0 }
   0x5   :  { %p234_p2 = pnand %p232_p1, %p229_p0 }
   0x7   :  { %237 = shalt.err (!%p234_p2)
}
   0x8   :  { %s238_s21 = scalar_lea.vmem %s17_s13, 64  ;;  %p243_p4 = scmp.lt.s32.totalorder %s17_s13, %s17_s13 }
   0x9   :  { %p239_p3 = scmp.ne.s32.totalorder %s17_s13, %s238_s21  ;;  %p244_p5 = scmp.lt.s32.totalorder %s238_s21, %s238_s21 }
   0xb   :  { %p245_p6 = por %p244_p5, %p243_p4 }
   0xd   :  { %p246_p7 = pnand %p245_p6, %p239_p3 }
   0xf   :  { %249 = shalt.err (!%p246_p7)
}
  0x10   :  { %19 = dma.hbm_to_vmem [thread:$0]  %s364_s0, 64, %s17_s13, [#allocation3]  }
  0x11   :  { %272 = dma.done.wait [#allocation3], 64  }
  0x12   :  { %273 = vsyncadd [#allocation3], 4294967232  ;;  %v27_v0 = vld [vmem:[#allocation2] sm:$0xf]  ;;  %s277_s24 = smov 32   ;;  %s278_s25 = smov 96   ;;  %v42_v3 = vlaneseq }
  0x13   :  { %35 = vrot.lane.b32.xlu1 %v27_v0, %s277_s24  ;;  %29 = vrot.lane.b32.xlu0 %v27_v0, %s278_s25  ;;  %s279_s26 = smov 64   ;;  %v280_v1 = vmov 1983009808   ;;  %v281_v6 = vmov 1934713408   ;;  %vm72_vm0 = vcmask 257024  }
  0x14   :  { %v40_v2 = vunpack.c.l.s4 %v280_v1  ;;  %v43_v5 = vshrl.u32 %v42_v3, 7  ;;  %v57_v7 = vunpack.c.l.s4 %v281_v6  ;;  %v282_v23 = vmov 0.0   ;;  %s283_s30 = smov [#allocation5]  }
  0x15   :  { %vm172_vm1 = vcmask 261120   ;;  %vm174_vm2 = vcmask 523264   ;;  %vm176_vm3 = vcmask 785408   ;;  %s201_s4 = sshll.u32 %s283_s30, 4  ;;  %s202_s4 = int_to_ptr.vmem [resolvable:$true] %s201_s4 }
  0x16   :  { %v41_v4 = vunpack.c.0.s8 %v40_v2  ;;  %v58_v12 = vunpack.c.0.s8 %v57_v7  ;;  %s250_s5 = scalar_lea.vmem %s202_s4, 64  ;;  %p255_p9 = scmp.lt.s32.totalorder %s202_s4, %s202_s4 }
  0x17   :  { %32 = vrot.lane.b32.xlu0 %v27_v0, %s279_s26  ;;  %p251_p8 = scmp.ne.s32.totalorder %s202_s4, %s250_s5  ;;  %p256_p10 = scmp.lt.s32.totalorder %s250_s5, %s250_s5 }
  0x18   :  { %v319_v10 = vsub.s32 %v41_v4, %v43_v5  ;;  %v322_v16 = vsub.s32 %v58_v12, %v43_v5 }
  0x19   :  { %p257_p11 = por %p256_p10, %p255_p9 }
  0x1b   :  { %p258_p12 = pnand %p257_p11, %p251_p8 }
  0x85   :  { %v36_v8 = vpop.permute.xlu1 %35  ;;  %v30_v9 = vpop.permute.xlu0 %29 }
  0x86   :  { %v46_v11 = vcombine.low %v30_v9, %v36_v8 }
  0x88   :  { %v53_v15 = vrot.slane %v46_v11, %v319_v10 }
  0x89   :  { %v33_v13 = vpop.permute.xlu0 %32 }
  0x8a   :  { %v38_v14 = vcombine.low %v27_v0, %v33_v13 }
  0x8c   :  { %v45_v17 = vrot.slane %v38_v14, %v319_v10 }
  0x8e   :  { %v54_v18 = vcombine.low %v45_v17, %v53_v15  ;;  %v55_v19 = vcombine.high %v45_v17, %v53_v15 }
  0x90   :  { %v69_v20 = vrot.slane %v55_v19, %v322_v16  ;;  %v62_v21 = vrot.slane %v54_v18, %v322_v16 }
  0x92   :  { %v73_v22 = vsel %vm72_vm0, %v62_v21, 0.0  ;;  %v70_v24 = vcombine.high %v62_v21, %v282_v23  ;;  %v71_v25 = vcombine.high %v69_v20, %v282_v23  ;;  %v79_v28 = vsel %vm72_vm0, %v69_v20, 0.0 }
  0x93   :  { %74 = vadd.xlane.f32.xlu1 %v73_v22  ;;  %v211_v22 = vld [vmem:[%s366_s2] ss:$0 sm:$0xff] }
  0x94   :  { %v76_v26 = vsel %vm72_vm0, %v70_v24, 0.0  ;;  %v82_v27 = vsel %vm72_vm0, %v71_v25, 0.0 }
  0x95   :  { %77 = vadd.xlane.f32.xlu0 %v76_v26 }
  0x97   :  { %83 = vadd.xlane.f32.xlu1 %v82_v27 }
  0x99   :  { %80 = vadd.xlane.f32.xlu0 %v79_v28 }
 0x120   :  { %v75_v29 = vpop.xlane.xlu1 %74 }
 0x121   :  { %v86_v30 = vmul.f32 0.03125, %v75_v29 }
 0x122   :  { %v78_v31 = vpop.xlane.xlu0 %77 }
 0x123   :  { %v90_v32 = vsub.f32 %v62_v21, %v86_v30  ;;  %v87_v33 = vmul.f32 0.03125, %v78_v31 }
 0x124   :  { %v84_v34 = vpop.xlane.xlu1 %83 }
 0x125   :  { %v91_v35 = vsub.f32 %v70_v24, %v87_v33  ;;  %v89_v36 = vmul.f32 0.03125, %v84_v34  ;;  %v94_v37 = vmul.f32 %v90_v32, %v90_v32 }
 0x126   :  { %v81_v38 = vpop.xlane.xlu0 %80 }
 0x127   :  { %v93_v39 = vsub.f32 %v71_v25, %v89_v36  ;;  %v88_v40 = vmul.f32 0.03125, %v81_v38  ;;  %v98_v41 = vsel %vm72_vm0, %v94_v37, 0.0  ;;  %v95_v42 = vmul.f32 %v91_v35, %v91_v35 }
 0x128   :  { %99 = vadd.xlane.f32.xlu0 %v98_v41 }
 0x129   :  { %v92_v43 = vsub.f32 %v69_v20, %v88_v40  ;;  %v101_v44 = vsel %vm72_vm0, %v95_v42, 0.0  ;;  %v97_v45 = vmul.f32 %v93_v39, %v93_v39 }
 0x12a   :  { %102 = vadd.xlane.f32.xlu1 %v101_v44 }
 0x12b   :  { %v96_v46 = vmul.f32 %v92_v43, %v92_v43  ;;  %v107_v47 = vsel %vm72_vm0, %v97_v45, 0.0 }
 0x12d   :  { %v104_v48 = vsel %vm72_vm0, %v96_v46, 0.0 }
 0x12e   :  { %108 = vadd.xlane.f32.xlu1 %v107_v47  ;;  %105 = vadd.xlane.f32.xlu0 %v104_v48 }
 0x1b5   :  { %v100_v49 = vpop.xlane.xlu0 %99 }
 0x1b6   :  { %v110_v50 = vmul.f32 0.03125, %v100_v49 }
 0x1b7   :  { %v103_v51 = vpop.xlane.xlu1 %102 }
 0x1b8   :  { %v111_v52 = vmul.f32 0.03125, %v103_v51  ;;  %v114_v54 = vadd.f32 1e-05, %v110_v50 }
 0x1ba   :  { %v115_v53 = vadd.f32 1e-05, %v111_v52 }
 0x1bb   :  { %v109_v55 = vpop.xlane.xlu1 %108  ;;  %v106_v56 = vpop.xlane.xlu0 %105 }
 0x1bc   :  { %v113_v57 = vmul.f32 0.03125, %v109_v55  ;;  %v112_v58 = vmul.f32 0.03125, %v106_v56  ;;  %220 = vrsqrt.f32 %v115_v53 }
 0x1bd   :  { %222 = vrsqrt.f32 %v114_v54 }
 0x1be   :  { %v117_v59 = vadd.f32 1e-05, %v113_v57  ;;  %v116_v60 = vadd.f32 1e-05, %v112_v58 }
 0x1c0   :  { %224 = vrsqrt.f32 %v117_v59 }
 0x1c1   :  { %226 = vrsqrt.f32 %v116_v60 }
 0x1c6   :  { %v221_v61 = vpop.eup %220 }
 0x1c7   :  { %v223_v62 = vpop.eup %222  ;;  %v123_v1 = vmul.f32 %v221_v61, %v91_v35 }
 0x1c8   :  { %v122_v3 = vmul.f32 %v223_v62, %v90_v32 }
 0x1ca   :  { %v225_v63 = vpop.eup %224 }
 0x1cb   :  { %v227_v0 = vpop.eup %226  ;;  %v125_v2 = vmul.f32 %v225_v63, %v93_v39 }
 0x1cc   :  { %v124_v4 = vmul.f32 %v227_v0, %v92_v43 }
 0x1cd   :  { %v134_v5 = vcombine.low %v123_v1, %v125_v2 }
 0x1ce   :  { %v126_v6 = vcombine.low %v122_v3, %v124_v4 }
 0x1cf   :  { %v141_v7 = vrot.slane %v134_v5, %v319_v10 }
 0x1d0   :  { %v133_v8 = vrot.slane %v126_v6, %v319_v10 }
 0x1d2   :  { %v143_v9 = vcombine.high %v133_v8, %v141_v7  ;;  %v142_v11 = vcombine.low %v133_v8, %v141_v7 }
 0x1d4   :  { %v157_v12 = vrot.slane %v143_v9, %v322_v16  ;;  %v150_v13 = vrot.slane %v142_v11, %v322_v16  ;;  %v210_v16 = vld [vmem:[%s365_s1] ss:$0 sm:$0xff] }
 0x1d6   :  { %165 = vrot.lane.b32.xlu1 %v157_v12, %s279_s26  ;;  %v158_v14 = vcombine.high %v150_v13, %v282_v23  ;;  %v159_v15 = vcombine.high %v157_v12, %v282_v23 }
 0x1d8   :  { %161 = vrot.lane.b32.xlu0 %v158_v14, %s277_s24 }
 0x1da   :  { %169 = vrot.lane.b32.xlu1 %v159_v15, %s278_s25 }
 0x248   :  { %v166_v17 = vpop.permute.xlu1 %165 }
 0x24a   :  { %v162_v10 = vpop.permute.xlu0 %161 }
 0x24b   :  { %v173_v18 = vsel %vm172_vm1, %v150_v13, %v162_v10 }
 0x24c   :  { %v170_v19 = vpop.permute.xlu1 %169  ;;  %v175_v20 = vsel %vm174_vm2, %v173_v18, %v166_v17 }
 0x24d   :  { %v177_v21 = vsel %vm176_vm3, %v175_v20, %v170_v19 }
 0x24e   :  { %v185_v23 = vmul.f32 %v210_v16, %v177_v21 }
 0x250   :  { %v193_v24 = vadd.f32 %v211_v22, %v185_v23 }
 0x252   :  { %194 = vst [vmem:[#allocation5] sm:$0xf] %v193_v24 }
 0x253   :  { %261 = shalt.err (!%p258_p12)
}
 0x254   :  { %s262_s7 = scalar_lea.hbm %s367_s3, 64 }
 0x255   :  { %p263_p13 = scmp.ne.s32.totalorder %s367_s3, %s262_s7  ;;  %p266_p0 = scmp.lt.u32.totalorder %s262_s7, %s367_s3 }
 0x257   :  { %p268_p1 = pnand %p266_p0, %p263_p13 }
 0x259   :  { %271 = shalt.err (!%p268_p1)
}
 0x25a   :  { %204 = dma.vmem_to_hbm [thread:$0]  %s202_s4, 64, %s367_s3, [#allocation4]  }
 0x25b   :  { %274 = dma.done.wait [#allocation4], 64  }
 0x25c   :  { %275 = vsyncadd [#allocation4], 4294967232 }
 0x25d   :  { %208 = vsyncpa [#allocation3], 1 }
 0x25e   :  { %209 = vsyncpa [#allocation4], 1 }

</bundles_post_ra>
